<compile_context>
chip_gen: v7x
topology: tpu7x:2x2x1
jax: 0.10.0
libtpu: 0.0.40
codegen_flags: <defaults>
</compile_context>

<pallas_src>
import functools

import numpy as np
import jax
import jax.numpy as jnp
from jax.experimental import pallas as pl
from jax.experimental.pallas import tpu as pltpu


# ------------------------- deterministic parameter setup -------------------------

def _hann_periodic(win_length):
    # scipy.signal.get_window('hann', win_length, fftbins=True)
    n = np.arange(win_length)
    return 0.5 - 0.5 * np.cos(2.0 * np.pi * n / win_length)


def _window_sumsquare(n_frames, hop_length, win_length, n_fft):
    # faithful port of window_sumsquare (norm=None)
    n = n_fft + hop_length * (n_frames - 1)
    x = np.zeros(n, dtype=np.float32)
    win_sq = _hann_periodic(win_length) ** 2
    pad = (n_fft - win_length) // 2
    win_sq = np.pad(win_sq, (pad, n_fft - win_length - pad))
    for i in range(n_frames):
        sample = i * hop_length
        x[sample:min(n, sample + n_fft)] += win_sq[:max(0, min(n_fft, n - sample))]
    return x


def _make_stft_bases(filter_length, hop_length, win_length):
    scale = filter_length / hop_length
    fourier_basis = np.fft.fft(np.eye(filter_length))
    cutoff = filter_length // 2 + 1
    fourier_basis = np.vstack([np.real(fourier_basis[:cutoff, :]),
                               np.imag(fourier_basis[:cutoff, :])])          # (2C, fl)
    forward_basis = fourier_basis.astype(np.float32)
    inverse_basis = np.linalg.pinv(scale * fourier_basis).T.astype(np.float32)

    fft_window = _hann_periodic(win_length)
    pad = (filter_length - win_length) // 2
    fft_window = np.pad(fft_window, (pad, filter_length - win_length - pad))
    fft_window = fft_window.astype(np.float32)

    forward_basis = forward_basis * fft_window[None, :]                       # (2C, fl)
    inverse_basis = inverse_basis * fft_window[None, :]                       # (2C, fl)
    return forward_basis, inverse_basis, cutoff


def _round_up(a, m):
    return (a + m - 1) // m * m


# --------------------------------- Pallas kernel ---------------------------------

def _stft_kernel(x_ref, fwd_ref, inv_ref, post_ref, out_ref,
                 *, R, OB, TB, WROWS, OFF, T):
    """One batch element x one block of OB output rows (hop samples per row)."""
    j = pl.program_id(1)
    base = pl.multiple_of(j * OB, 8)          # start row in the folded signal
    c2p = fwd_ref.shape[2]
    hop = out_ref.shape[2]

    # signal window for this block (aligned dynamic sublane slice, bf16)
    W = x_ref[0, pl.ds(base, WROWS), :]                                       # (WROWS, hop)

    # ---- forward STFT: rec[i, :] = sum_r  xs[base + i + r, :] @ fwd[r] -----------
    rec = jnp.zeros((TB, c2p), jnp.float32)
    for r in range(R):
        rec = rec + jnp.dot(W[r:r + TB, :], fwd_ref[r],
                            preferred_element_type=jnp.float32)

    # mask halo frames outside the valid STFT frame range [0, T)
    tglob = (base - OFF) + jax.lax.broadcasted_iota(jnp.int32, (TB, 1), 0)
    rec = jnp.where((tglob >= 0) & (tglob < T), rec, 0.0)

    # magnitude/phase recombination is the identity (mag*cos(atan2(im,re)) == re),
    # so rec is reused directly for the inverse transform.
    rec = rec.astype(inv_ref.dtype)

    # ---- inverse STFT + overlap-add fold -----------------------------------------
    #   out[p, :] = sum_q  rec[p + R - 1 - q, :] @ inv[q]
    acc = jnp.zeros((OB, hop), jnp.float32)
    for q in range(R):
        acc = acc + jnp.dot(rec[R - 1 - q:R - 1 - q + OB, :], inv_ref[q],
                            preferred_element_type=jnp.float32)

    # window-sum normalisation + fl/hop scale, pre-folded into `post`
    out_ref[0] = acc * post_ref[...]


# ----------------------------------- wrapper -------------------------------------

def stft_forward(x, filter_length=32, hop_length=8, win_length=32, block_rows=64):
    """Forward pass of the STFT module: transform -> (mag, phase) -> inverse."""
    B, N = x.shape
    fl, hop = filter_length, hop_length
    assert fl % hop == 0, "filter_length must be a multiple of hop_length"
    R = fl // hop
    assert R >= 2 and R % 2 == 0, "filter_length / hop_length must be even"
    # TODO(synk): support num_samples that is not a multiple of hop_length
    #             (pad the signal and crop the reconstruction).
    assert N % hop == 0

    forward_basis, inverse_basis, cutoff = _make_stft_bases(fl, hop, win_length)
    C2 = 2 * cutoff
    C2p = _round_up(C2, 128)                     # lane-dense frequency axis

    M = N // hop                                 # cropped output rows (hop samples each)
    T = N // hop + 1                             # number of STFT frames
    OB = min(_round_up(M, 8), _round_up(block_rows, 8))
    M_pad = _round_up(M, OB)
    n_blocks = M_pad // OB
    TB = _round_up(OB + R - 1, 8)                # frames (incl. halo) per block
    WROWS = _round_up(TB + R - 1, 8)             # signal rows read per block
    OFF = R // 2 - 1                             # frame index offset from the crop

    # ---- glue: reflect pad + fold to (rows, hop) + leading zero rows (host side) --
    xpad = jnp.pad(x.astype(jnp.float32), ((0, 0), (fl // 2, fl // 2)), mode="reflect")
    P = (N + fl) // hop
    P_xs = _round_up(M_pad - OB + WROWS, 8)
    assert P_xs >= OFF + P
    xs = jnp.zeros((B, P_xs, hop), jnp.float32)
    xs = xs.at[:, OFF:OFF + P, :].set(xpad.reshape(B, P, hop))
    xs = xs.astype(jnp.bfloat16)

    # ---- fused forward basis (R, hop, 2C_pad) and inverse basis (R, 2C_pad, hop) --
    fwdT = np.zeros((fl, C2p), np.float32)
    fwdT[:, :C2] = forward_basis.T
    fwd_r = np.ascontiguousarray(fwdT.reshape(R, hop, C2p))

    invp = np.zeros((C2p, fl), np.float32)
    invp[:C2, :] = inverse_basis
    inv_r = np.ascontiguousarray(invp.reshape(C2p, R, hop).transpose(1, 0, 2))

    # ---- window-sum normalisation + scale, cropped & folded to (M_pad, hop) -------
    wsum = _window_sumsquare(T, hop, win_length, fl)
    ws = wsum[fl // 2: fl // 2 + N]
    tiny = np.finfo(np.float32).tiny
    scale = float(fl) / hop
    ws_safe = np.where(ws > tiny, ws, 1.0)
    post = np.where(ws > tiny, scale / ws_safe, scale).astype(np.float32)
    post_pad = np.zeros((M_pad * hop,), np.float32)
    post_pad[:N] = post
    post2d = post_pad.reshape(M_pad, hop)

    kernel = functools.partial(_stft_kernel, R=R, OB=OB, TB=TB, WROWS=WROWS,
                               OFF=OFF, T=T)

    out2d = pl.pallas_call(
        kernel,
        out_shape=jax.ShapeDtypeStruct((B, M_pad, hop), jnp.float32),
        grid=(B, n_blocks),
        in_specs=[
            pl.BlockSpec((1, P_xs, hop), lambda b, j: (b, 0, 0)),     # folded signal
            pl.BlockSpec((R, hop, C2p), lambda b, j: (0, 0, 0)),      # forward basis
            pl.BlockSpec((R, C2p, hop), lambda b, j: (0, 0, 0)),      # inverse basis
            pl.BlockSpec((OB, hop), lambda b, j: (j, 0)),             # post multiplier
        ],
        out_specs=pl.BlockSpec((1, OB, hop), lambda b, j: (b, j, 0)),
        compiler_params=pltpu.CompilerParams(
            dimension_semantics=("parallel", "parallel"),
            vmem_limit_bytes=48 * 1024 * 1024),
    )(xs, jnp.asarray(fwd_r, jnp.bfloat16), jnp.asarray(inv_r, jnp.bfloat16),
      jnp.asarray(post2d))

    # crop the padded rows and present as (B, 1, num_samples), as in PyTorch
    return out2d[:, :M, :].reshape(B, 1, N)


if __name__ == "__main__":
    key = jax.random.PRNGKey(0)
    # small shapes consistent with the module: (batch, num_samples)
    B, num_samples = 2, 128
    x = jax.random.normal(key, (B, num_samples), dtype=jnp.float32)

    # block_rows=8 -> 2 output blocks per batch element, exercising both grid axes.
    recon = stft_forward(x, filter_length=32, hop_length=8, win_length=32, block_rows=8)
    recon = jax.block_until_ready(recon)

    assert recon.shape == (B, 1, num_samples)
    r = np.asarray(recon)
    assert np.all(np.isfinite(r))
    # STFT->iSTFT with window-sum correction is (near) perfect reconstruction;
    # loose tolerance accommodates bf16 inputs/bases with fp32 MXU accumulation.
    np.testing.assert_allclose(r[:, 0, :], np.asarray(x), atol=0.15, rtol=0.0)

    print("KERNEL_OK")
</pallas_src>

<mosaic_0001>
module attributes {stable_mosaic.version = 11 : i64} {
  func.func @_stft_kernel(%arg0: i32, %arg1: i32, %arg2: memref<1x32x8xbf16, #tpu.memory_space<vmem>>, %arg3: memref<4x8x128xbf16, #tpu.memory_space<vmem>>, %arg4: memref<4x128x8xbf16, #tpu.memory_space<vmem>>, %arg5: memref<8x8xf32, #tpu.memory_space<vmem>>, %arg6: memref<1x8x8xf32, #tpu.memory_space<vmem>>) attributes {dimension_semantics = [#tpu.dimension_semantics<parallel>, #tpu.dimension_semantics<parallel>], iteration_bounds = array<i64: 2, 2>, scalar_prefetch = 0 : i64, scratch_operands = 0 : i64, tpu.core_type = #tpu.core_type<tc>, window_params = [{transform_indices = @transform_0, window_bounds = array<i64: 1, 32, 8>}, {pipeline_mode = #tpu.pipeline_mode<synchronous>, transform_indices = @transform_1, window_bounds = array<i64: 4, 8, 128>}, {pipeline_mode = #tpu.pipeline_mode<synchronous>, transform_indices = @transform_2, window_bounds = array<i64: 4, 128, 8>}, {transform_indices = @transform_3, window_bounds = array<i64: 8, 8>}, {transform_indices = @transform_4, window_bounds = array<i64: 1, 8, 8>}]} {
    %c8_i32 = arith.constant 8 : i32
    %0 = arith.muli %arg1, %c8_i32 : i32
    %1 = tpu.assume_multiple %0, 8 : i32
    %c0 = arith.constant 0 : index
    %2 = arith.index_cast %1 : i32 to index
    %c0_0 = arith.constant 0 : index
    %3 = vector.load %arg2[%c0, %2, %c0_0] : memref<1x32x8xbf16, #tpu.memory_space<vmem>>, vector<1x24x8xbf16>
    %4 = vector.shape_cast %3 : vector<1x24x8xbf16> to vector<24x8xbf16>
    %cst = arith.constant 0.000000e+00 : f32
    %5 = vector.broadcast %cst : f32 to vector<16x128xf32>
    %6 = vector.extract_strided_slice %4 {offsets = [0, 0], sizes = [16, 8], strides = [1, 1]} : vector<24x8xbf16> to vector<16x8xbf16>
    %c0_1 = arith.constant 0 : index
    %c0_2 = arith.constant 0 : index
    %c0_3 = arith.constant 0 : index
    %7 = vector.load %arg3[%c0_1, %c0_2, %c0_3] : memref<4x8x128xbf16, #tpu.memory_space<vmem>>, vector<1x8x128xbf16>
    %8 = vector.shape_cast %7 : vector<1x8x128xbf16> to vector<8x128xbf16>
    %cst_4 = arith.constant dense<0.000000e+00> : vector<16x128xf32>
    %9 = tpu.matmul %6, %8, %cst_4 {dimension_numbers = #tpu.dot_dimension_numbers<[1], [0], [0], [1], [0, 0, 1, 1], [], []>} : vector<16x8xbf16>, vector<8x128xbf16>, vector<16x128xf32> -> vector<16x128xf32>
    %10 = arith.addf %5, %9 : vector<16x128xf32>
    %11 = vector.extract_strided_slice %4 {offsets = [1, 0], sizes = [16, 8], strides = [1, 1]} : vector<24x8xbf16> to vector<16x8xbf16>
    %c1 = arith.constant 1 : index
    %c0_5 = arith.constant 0 : index
    %c0_6 = arith.constant 0 : index
    %12 = vector.load %arg3[%c1, %c0_5, %c0_6] : memref<4x8x128xbf16, #tpu.memory_space<vmem>>, vector<1x8x128xbf16>
    %13 = vector.shape_cast %12 : vector<1x8x128xbf16> to vector<8x128xbf16>
    %cst_7 = arith.constant dense<0.000000e+00> : vector<16x128xf32>
    %14 = tpu.matmul %11, %13, %cst_7 {dimension_numbers = #tpu.dot_dimension_numbers<[1], [0], [0], [1], [0, 0, 1, 1], [], []>} : vector<16x8xbf16>, vector<8x128xbf16>, vector<16x128xf32> -> vector<16x128xf32>
    %15 = arith.addf %10, %14 : vector<16x128xf32>
    %16 = vector.extract_strided_slice %4 {offsets = [2, 0], sizes = [16, 8], strides = [1, 1]} : vector<24x8xbf16> to vector<16x8xbf16>
    %c2 = arith.constant 2 : index
    %c0_8 = arith.constant 0 : index
    %c0_9 = arith.constant 0 : index
    %17 = vector.load %arg3[%c2, %c0_8, %c0_9] : memref<4x8x128xbf16, #tpu.memory_space<vmem>>, vector<1x8x128xbf16>
    %18 = vector.shape_cast %17 : vector<1x8x128xbf16> to vector<8x128xbf16>
    %cst_10 = arith.constant dense<0.000000e+00> : vector<16x128xf32>
    %19 = tpu.matmul %16, %18, %cst_10 {dimension_numbers = #tpu.dot_dimension_numbers<[1], [0], [0], [1], [0, 0, 1, 1], [], []>} : vector<16x8xbf16>, vector<8x128xbf16>, vector<16x128xf32> -> vector<16x128xf32>
    %20 = arith.addf %15, %19 : vector<16x128xf32>
    %21 = vector.extract_strided_slice %4 {offsets = [3, 0], sizes = [16, 8], strides = [1, 1]} : vector<24x8xbf16> to vector<16x8xbf16>
    %c3 = arith.constant 3 : index
    %c0_11 = arith.constant 0 : index
    %c0_12 = arith.constant 0 : index
    %22 = vector.load %arg3[%c3, %c0_11, %c0_12] : memref<4x8x128xbf16, #tpu.memory_space<vmem>>, vector<1x8x128xbf16>
    %23 = vector.shape_cast %22 : vector<1x8x128xbf16> to vector<8x128xbf16>
    %cst_13 = arith.constant dense<0.000000e+00> : vector<16x128xf32>
    %24 = tpu.matmul %21, %23, %cst_13 {dimension_numbers = #tpu.dot_dimension_numbers<[1], [0], [0], [1], [0, 0, 1, 1], [], []>} : vector<16x8xbf16>, vector<8x128xbf16>, vector<16x128xf32> -> vector<16x128xf32>
    %25 = arith.addf %20, %24 : vector<16x128xf32>
    %c1_i32 = arith.constant 1 : i32
    %26 = arith.subi %1, %c1_i32 : i32
    %27 = tpu.iota {dimensions = array<i32: 0>} : vector<16x1xi32>
    %28 = vector.broadcast %26 : i32 to vector<16x1xi32>
    %29 = arith.addi %28, %27 : vector<16x1xi32>
    %c0_i32 = arith.constant 0 : i32
    %30 = vector.broadcast %c0_i32 : i32 to vector<16x1xi32>
    %31 = arith.cmpi sge, %29, %30 : vector<16x1xi32>
    %c17_i32 = arith.constant 17 : i32
    %32 = vector.broadcast %c17_i32 : i32 to vector<16x1xi32>
    %33 = arith.cmpi slt, %29, %32 : vector<16x1xi32>
    %34 = arith.andi %31, %33 : vector<16x1xi1>
    %cst_14 = arith.constant 0.000000e+00 : f32
    %35 = vector.shape_cast %34 : vector<16x1xi1> to vector<16x1xi1>
    %36 = vector.broadcast %35 : vector<16x1xi1> to vector<16x128xi1>
    %37 = vector.broadcast %cst_14 : f32 to vector<16x128xf32>
    %38 = arith.select %36, %25, %37 : vector<16x128xi1>, vector<16x128xf32>
    %39 = arith.truncf %38 : vector<16x128xf32> to vector<16x128xbf16>
    %cst_15 = arith.constant 0.000000e+00 : f32
    %40 = vector.broadcast %cst_15 : f32 to vector<8x8xf32>
    %41 = vector.extract_strided_slice %39 {offsets = [3, 0], sizes = [8, 128], strides = [1, 1]} : vector<16x128xbf16> to vector<8x128xbf16>
    %c0_16 = arith.constant 0 : index
    %c0_17 = arith.constant 0 : index
    %c0_18 = arith.constant 0 : index
    %42 = vector.load %arg4[%c0_16, %c0_17, %c0_18] : memref<4x128x8xbf16, #tpu.memory_space<vmem>>, vector<1x128x8xbf16>
    %43 = vector.shape_cast %42 : vector<1x128x8xbf16> to vector<128x8xbf16>
    %cst_19 = arith.constant dense<0.000000e+00> : vector<8x8xf32>
    %44 = tpu.matmul %41, %43, %cst_19 {dimension_numbers = #tpu.dot_dimension_numbers<[1], [0], [0], [1], [0, 0, 1, 1], [], []>} : vector<8x128xbf16>, vector<128x8xbf16>, vector<8x8xf32> -> vector<8x8xf32>
    %45 = arith.addf %40, %44 : vector<8x8xf32>
    %46 = vector.extract_strided_slice %39 {offsets = [2, 0], sizes = [8, 128], strides = [1, 1]} : vector<16x128xbf16> to vector<8x128xbf16>
    %c1_20 = arith.constant 1 : index
    %c0_21 = arith.constant 0 : index
    %c0_22 = arith.constant 0 : index
    %47 = vector.load %arg4[%c1_20, %c0_21, %c0_22] : memref<4x128x8xbf16, #tpu.memory_space<vmem>>, vector<1x128x8xbf16>
    %48 = vector.shape_cast %47 : vector<1x128x8xbf16> to vector<128x8xbf16>
    %cst_23 = arith.constant dense<0.000000e+00> : vector<8x8xf32>
    %49 = tpu.matmul %46, %48, %cst_23 {dimension_numbers = #tpu.dot_dimension_numbers<[1], [0], [0], [1], [0, 0, 1, 1], [], []>} : vector<8x128xbf16>, vector<128x8xbf16>, vector<8x8xf32> -> vector<8x8xf32>
    %50 = arith.addf %45, %49 : vector<8x8xf32>
    %51 = vector.extract_strided_slice %39 {offsets = [1, 0], sizes = [8, 128], strides = [1, 1]} : vector<16x128xbf16> to vector<8x128xbf16>
    %c2_24 = arith.constant 2 : index
    %c0_25 = arith.constant 0 : index
    %c0_26 = arith.constant 0 : index
    %52 = vector.load %arg4[%c2_24, %c0_25, %c0_26] : memref<4x128x8xbf16, #tpu.memory_space<vmem>>, vector<1x128x8xbf16>
    %53 = vector.shape_cast %52 : vector<1x128x8xbf16> to vector<128x8xbf16>
    %cst_27 = arith.constant dense<0.000000e+00> : vector<8x8xf32>
    %54 = tpu.matmul %51, %53, %cst_27 {dimension_numbers = #tpu.dot_dimension_numbers<[1], [0], [0], [1], [0, 0, 1, 1], [], []>} : vector<8x128xbf16>, vector<128x8xbf16>, vector<8x8xf32> -> vector<8x8xf32>
    %55 = arith.addf %50, %54 : vector<8x8xf32>
    %56 = vector.extract_strided_slice %39 {offsets = [0, 0], sizes = [8, 128], strides = [1, 1]} : vector<16x128xbf16> to vector<8x128xbf16>
    %c3_28 = arith.constant 3 : index
    %c0_29 = arith.constant 0 : index
    %c0_30 = arith.constant 0 : index
    %57 = vector.load %arg4[%c3_28, %c0_29, %c0_30] : memref<4x128x8xbf16, #tpu.memory_space<vmem>>, vector<1x128x8xbf16>
    %58 = vector.shape_cast %57 : vector<1x128x8xbf16> to vector<128x8xbf16>
    %cst_31 = arith.constant dense<0.000000e+00> : vector<8x8xf32>
    %59 = tpu.matmul %56, %58, %cst_31 {dimension_numbers = #tpu.dot_dimension_numbers<[1], [0], [0], [1], [0, 0, 1, 1], [], []>} : vector<8x128xbf16>, vector<128x8xbf16>, vector<8x8xf32> -> vector<8x8xf32>
    %60 = arith.addf %55, %59 : vector<8x8xf32>
    %c0_32 = arith.constant 0 : index
    %c0_33 = arith.constant 0 : index
    %61 = vector.load %arg5[%c0_32, %c0_33] : memref<8x8xf32, #tpu.memory_space<vmem>>, vector<8x8xf32>
    %62 = arith.mulf %60, %61 : vector<8x8xf32>
    %c0_34 = arith.constant 0 : index
    %c0_35 = arith.constant 0 : index
    %c0_36 = arith.constant 0 : index
    %63 = vector.load %arg6[%c0_34, %c0_35, %c0_36] : memref<1x8x8xf32, #tpu.memory_space<vmem>>, vector<1x8x8xf32>
    %64 = vector.shape_cast %63 : vector<1x8x8xf32> to vector<8x8xf32>
    %65 = vector.shape_cast %62 : vector<8x8xf32> to vector<1x8x8xf32>
    tpu.vector_store %arg6[%c0_34, %c0_35, %c0_36], %65 {strides = array<i32>} : memref<1x8x8xf32, #tpu.memory_space<vmem>>, vector<1x8x8xf32>,
    return
  }
  func.func @transform_0(%arg0: i32, %arg1: i32) -> (i32, i32, i32) {
    %c0_i32 = arith.constant 0 : i32
    %c0_i32_0 = arith.constant 0 : i32
    %c0_i32_1 = arith.constant 0 : i32
    return %arg0, %c0_i32, %c0_i32_0 : i32, i32, i32
  }
  func.func @transform_1(%arg0: i32, %arg1: i32) -> (i32, i32, i32) {
    %c0_i32 = arith.constant 0 : i32
    %c0_i32_0 = arith.constant 0 : i32
    %c0_i32_1 = arith.constant 0 : i32
    %c0_i32_2 = arith.constant 0 : i32
    return %c0_i32, %c0_i32_0, %c0_i32_1 : i32, i32, i32
  }
  func.func @transform_2(%arg0: i32, %arg1: i32) -> (i32, i32, i32) {
    %c0_i32 = arith.constant 0 : i32
    %c0_i32_0 = arith.constant 0 : i32
    %c0_i32_1 = arith.constant 0 : i32
    %c0_i32_2 = arith.constant 0 : i32
    return %c0_i32, %c0_i32_0, %c0_i32_1 : i32, i32, i32
  }
  func.func @transform_3(%arg0: i32, %arg1: i32) -> (i32, i32) {
    %c0_i32 = arith.constant 0 : i32
    %c0_i32_0 = arith.constant 0 : i32
    return %arg1, %c0_i32 : i32, i32
  }
  func.func @transform_4(%arg0: i32, %arg1: i32) -> (i32, i32, i32) {
    %c0_i32 = arith.constant 0 : i32
    %c0_i32_0 = arith.constant 0 : i32
    return %arg0, %arg1, %c0_i32 : i32, i32, i32
  }
}

</mosaic_0001>

<bundles_post_ra>
// kernel: tpu_custom_call.1
= control target key start
LH: loop header
LB: loop body
LE: loop exit
PB: predicated region body
PF: predicated region fallthrough
CT: control target
= control target key end

     0   :  { %s1450_s15 = smov 0   ;;  %s1452_s16 = smov 0   ;;  %s1711_s0 = inlined_call_operand.vmem [shape: bf16[2,32,8], index: 0, kind: input, shape index: {}]   ;;  %s1712_s1 = inlined_call_operand.vmem [shape: bf16[4,8,128], index: 1, kind: input, shape index: {}]   ;;  %s1713_s2 = inlined_call_operand.vmem [shape: bf16[4,128,8], index: 2, kind: input, shape index: {}]   ;;  %s1714_s3 = inlined_call_operand.vmem [shape: f32[16,8], index: 3, kind: input, shape index: {}]   ;;  %s1715_s4 = inlined_call_operand.vmem [shape: f32[2,16,8], index: 4, kind: output, shape index: {}]  }
   0x1   :  { %s1454_s17 = smov 0   ;;  %s1456_s18 = smov 0  }
   0x2   :  { %s1458_s19 = smov 0  }
   0x3 LB: > { %s23_s20 = sadd.s32 1, %s1413_s17  ;;  %s26_s21 = sadd.s32 1, %s1417_s18  ;;  %s1421_s19 = sphi %s1458_s19, %s14_s19   ;;  %s1417_s18 = sphi %s1456_s18, %s1723_s18   ;;  %s1413_s17 = sphi %s1454_s17, %s1722_s17   ;;  %s1409_s16 = sphi %s1452_s16, %s1721_s16   ;;  %s1405_s15 = sphi %s1450_s15, %s1720_s15  }
   0x4   : > { %p24_p0 = scmp.ge.s32.totalorder %s23_s20, 2  ;;  %p1036_p1 = scmp.ge.s32.totalorder %s1421_s19, 1 }
   0x5   : > { %p185_p2 = scmp.lt.s32.totalorder %s1421_s19, 5 }
   0x6   : > { %s1725_s20 = smov (%p24_p0, %s23_s20), 0  ;;  %s1727_s21 = smov (!%p24_p0, %s26_s21), %s1417_s18 }
   0x7   : > { %p186_p3 = pnand %p1036_p1, %p185_p2  ;;  %p28_p4 = scmp.ge.s32.totalorder %s1727_s21, 2 }
   0x8   : > { %vm272_vm0 = vcmask (!%p186_p3), 1043456   ;;  %v1049_v0 = vld [vmem:[%s1712_s1 + $0x8] sm:$0xf] (!%p186_p3)  ;;  %p218_p5 = scmp.lt.s32.totalorder (!%p186_p3), %s1409_s16, 1  ;;  %v1423_v1 = vmov (!%p186_p3), 0.0   ;;  %s1042_s26 = sshll.u32 (!%p186_p3), %s1405_s15, 3  ;;  %v480_v45 = vlaneseq (!%p186_p3) }
   0x9   : > { %s1729_s21 = smov (%p28_p4, %s1727_s21), 0  ;;  %189 = sbr.rel (%p186_p3) target bundleno = 514 (0x202), region = 36 }
   0xa   : > { %1196 = vmatprep.subr.bf16.mxu0 (!%p186_p3), %v1423_v1  ;;  %v373_v2 = vsel (!%p186_p3), %vm272_vm0, %v1049_v0, 0  ;;  %1184 = vmatprep.subr.bf16.mxu1 (!%p186_p3), %v1423_v1  ;;  %v1044_v3 = vld [vmem:[%s1712_s1 + $0x4] sm:$0xf] (!%p186_p3)  ;;  %vm1424_vm1 = vmmov (!%p186_p3), 0   ;;  %s237_s27 = sshra.s32 (!%p186_p3), %s1042_s26, 3  ;;  %vm268_vm2 = vcmask (!%p186_p3), 64512  }
   0xb   : > { %1197 = vmatpush3.bf16.msra.mxu0 (!%p186_p3), %v373_v2  ;;  %1198 = vmatprep.mubr.msk.bf16.mxu0 (!%p186_p3), %vm1424_vm1, %v1423_v1  ;;  %v274_v4 = vsel (!%p186_p3), %vm272_vm0, %v1044_v3, 0  ;;  %s1043_s29 = sshll.u32 (!%p186_p3), %s237_s27, 2  ;;  %vm255_vm3 = vsmask.f32 (!%p186_p3), 7424  ;;  %vm365_vm4 = vcmask (!%p186_p3), 1046528   ;;  %v1351_v28 = vld [vmem:[%s1713_s2 + $0x40] sm:$0xff] (!%p186_p3)  }
   0xc   : > { %1185 = vmatpush3.bf16.msra.mxu1 (!%p186_p3), %v274_v4  ;;  %1186 = vmatprep.mubr.msk.bf16.mxu1 (!%p186_p3), %vm1424_vm1, %v1423_v1  ;;  %v1051_v7 = vld [vmem:[%s1712_s1 + $0xc] sm:$0xf] (!%p186_p3)  ;;  %v244_v8 = vld [vmem:[%s1712_s1] sm:$0xf] (!%p186_p3)  ;;  %vm420_vm5 = vsmask.f32 (!%p186_p3), 6400 }
   0xd   : > { %1190 = vmatprep.subr.bf16.mxu1 (!%p186_p3), %v1423_v1  ;;  %1202 = vmatprep.subr.bf16.mxu0 (!%p186_p3), %v1423_v1  ;;  %v434_v14 = vsel (!%p186_p3), %vm272_vm0, %v1051_v7, 0  ;;  %v320_v19 = vsel (!%p186_p3), %vm272_vm0, %v244_v8, 0  ;;  %v1352_v30 = vld [vmem:[%s1713_s2 + $0x48] sm:$0xff] (!%p186_p3)   ;;  %v1353_v31 = vld [vmem:[%s1713_s2 + $0x80] sm:$0xff] (!%p186_p3)   ;;  %v1354_v32 = vld [vmem:[%s1713_s2 + $0x50] sm:$0xff] (!%p186_p3)   ;;  %v481_v46 = vshrl.u32 (!%p186_p3), %v480_v45, 7 }
   0xe   : > { %v1355_v33 = vld [vmem:[%s1713_s2 + $0x88] sm:$0xff] (!%p186_p3)   ;;  %v1356_v34 = vld [vmem:[%s1713_s2 + $0x58] sm:$0xff] (!%p186_p3)   ;;  %v1357_v35 = vld [vmem:[%s1713_s2 + $0x90] sm:$0xff] (!%p186_p3)   ;;  %s1053_s8 = sadd.s32 (!%p186_p3), 4294967295, %s1042_s26  ;;  %p223_p6 = scmp.lt.s32.totalorder (!%p186_p3), %s1405_s15, 1 }
   0xf   : > { %v1358_v36 = vld [vmem:[%s1713_s2 + $0x60] sm:$0xff] (!%p186_p3)   ;;  %v1359_v37 = vld [vmem:[%s1713_s2 + $0x98] sm:$0xff] (!%p186_p3)   ;;  %v1360_v38 = vld [vmem:[%s1713_s2 + $0x68] sm:$0xff] (!%p186_p3)   ;;  %v483_v47 = vstv (!%p186_p3), %s1053_s8  ;;  %v482_v48 = vadd.s32 (!%p186_p3), 8, %v481_v46 }
  0x10   : > { %s1731_s16 = smov (!%p218_p5, %s1409_s16), 1  ;;  %v1361_v39 = vld [vmem:[%s1713_s2 + $0xa0] sm:$0xff]   ;;  %v1362_v40 = vld [vmem:[%s1713_s2 + $0x70] sm:$0xff]   ;;  %v1363_v41 = vld [vmem:[%s1713_s2 + $0xa8] sm:$0xff]   ;;  %v484_v49 = vadd.s32 %v483_v47, %v481_v46  ;;  %s1733_s15 = smov (!%p223_p6, %s1405_s15), 1 }
  0x11   : > { %s1139_s28 = sshll.u32 %s1731_s16, 4  ;;  %v1364_v42 = vld [vmem:[%s1713_s2 + $0x78] sm:$0xff]   ;;  %v1365_v43 = vld [vmem:[%s1713_s2 + $0xb0] sm:$0xff]   ;;  %v485_v50 = vadd.s32 %v483_v47, %v482_v48  ;;  %v1366_v4 = vld [vmem:[%s1713_s2] sm:$0xff]   ;;  %s1039_s30 = sshll.u32 %s1733_s15, 3 }
  0x12   : > { %s222_s6 = scalar_lea.vmem %s1711_s0, %s1139_s28  ;;  %v1367_v44 = vld [vmem:[%s1713_s2 + $0xb8] sm:$0xff]   ;;  %vm486_vm6 = vcmp.ge.s32.totalorder %v484_v49, 0  ;;  %vm488_vm7 = vcmp.lt.s32.totalorder %v484_v49, 17  ;;  %s226_s8 = scalar_lea.vmem %s1714_s3, %s1039_s30 }
  0x13   : > { %s240_s7 = scalar_lea.vmem %s222_s6, %s1043_s29  ;;  %vm487_vm8 = vcmp.ge.s32.totalorder %v485_v50, 0  ;;  %vm489_vm9 = vcmp.lt.s32.totalorder %v485_v50, 17  ;;  %vm1598_vm10 = vmand %vm486_vm6, %vm488_vm7  ;;  %s1040_s29 = sshll.u32 %s1731_s16, 1 }
  0x14   : > { %v1349_v5 = vld [vmem:[%s240_s7] sm:$0xff]   ;;  %v1350_v6 = vld [vmem:[%s240_s7 + $0x8] ss:$0 sps:$4 sm:$0xff]   ;;  %vm1602_vm11 = vmand %vm487_vm8, %vm489_vm9  ;;  %s232_s5 = sadd.s32 %s1040_s29, %s1733_s15 }
  0x15   : > { %v366_v9 = vrot.slane %v1349_v5, 1  ;;  %v367_v10 = vrot.slane %v1350_v6, 1  ;;  %v257_v11 = vshrl.u32 %v1349_v5, 16  ;;  %v259_v12 = vshll.u32 %v1349_v5, 16  ;;  %vm1134_vm12 = vmpackc.low %vm1602_vm11, %vm1598_vm10  ;;  %s1041_s26 = sshll.u32 %s232_s5, 3 }
  0x16   : > { %v264_v13 = vshll.u32 %v1350_v6, 16  ;;  %v424_v15 = vshrl.u32 %v1350_v6, 16  ;;  %s234_s11 = scalar_lea.vmem %s1715_s4, %s1041_s26 }
  0x17   : > { %v368_v16 = vsel %vm365_vm4, %v366_v9, %v367_v10  ;;  %v261_v17 = vrot.slane %v259_v12, 1  ;;  %v421_v18 = vrot.slane %v257_v11, 1  ;;  %v422_v22 = vrot.slane %v259_v12, 2  ;;  %v1368_v9 = vld [vmem:[%s1713_s2 + $0x8] sm:$0xff]   ;;  %v1369_v10 = vld [vmem:[%s1713_s2 + $0xc0] sm:$0xff]   ;;  %v1370_v12 = vld [vmem:[%s1713_s2 + $0x10] sm:$0xff]  }
  0x18   : > { %1199 = vmatmul.mubr.msk.bf16.vlgmr.msra.gmra.mrb[0].mxu0 %vm268_vm2, %v368_v16  ;;  %v266_v20 = vrot.slane %v264_v13, 1  ;;  %v427_v21 = vrot.slane %v264_v13, 2  ;;  %v426_v23 = vrot.slane %v424_v15, 1  ;;  %v1371_v13 = vld [vmem:[%s1713_s2 + $0xc8] sm:$0xff]   ;;  %v1373_v15 = vld [vmem:[%s1713_s2 + $0xd0] sm:$0xff]   ;;  %v1374_v16 = vld [vmem:[%s1713_s2 + $0x20] sm:$0xff]  }
  0x19   : > { %v262_v24 = vor.u32 %v261_v17, %v257_v11  ;;  %1203 = vmatpush3.bf16.msra.mxu0 %v434_v14  ;;  %1204 = vmatprep.mubr.msk.bf16.mxu0 %vm1424_vm1, %v1423_v1  ;;  %v423_v26 = vor.u32 %v422_v22, %v421_v18  ;;  %v1372_v14 = vld [vmem:[%s1713_s2 + $0x18] sm:$0xff]   ;;  %v1376_v18 = vld [vmem:[%s1713_s2 + $0x28] sm:$0xff]  }
  0x1a   : > { %1208 = vmatprep.subr.bf16.mxu0 %v1423_v1  ;;  %v428_v27 = vor.u32 %v427_v21, %v426_v23  ;;  %v1375_v17 = vld [vmem:[%s1713_s2 + $0xd8] sm:$0xff]   ;;  %v1379_v21 = vld [vmem:[%s1713_s2 + $0xe8] sm:$0xff]   ;;  %v1381_v23 = vld [vmem:[%s1713_s2 + $0xf0] sm:$0xff]  }
  0x1b   : > { %v267_v25 = vsel %vm255_vm3, %v262_v24, %v266_v20  ;;  %v1378_v20 = vld [vmem:[%s1713_s2 + $0x30] sm:$0xff]   ;;  %v1380_v22 = vld [vmem:[%s1713_s2 + $0x38] sm:$0xff]  }
  0x1c   : > { %1187 = vmatmul.mubr.msk.bf16.vlgmr.msra.gmra.mrb[0].mxu1 %vm268_vm2, %v267_v25  ;;  %v429_v29 = vsel %vm420_vm5, %v423_v26, %v428_v27  ;;  %v1382_v26 = vld [vmem:[%s1713_s2 + $0xf8] sm:$0xff]  }
  0x1d   : > { %1191 = vmatpush3.bf16.msra.mxu1 %v320_v19  ;;  %1192 = vmatprep.mubr.msk.bf16.mxu1 %vm1424_vm1, %v1423_v1  ;;  %v1377_v19 = vld [vmem:[%s1713_s2 + $0xe0] sm:$0xff]  }
  0x1e   : > { %1248 = vmatprep.subr.bf16.mxu1 %v1423_v1 }
  0x24   : > { %1205 = vmatmul.mubr.msk.bf16.vlgmr.msra.gmra.mrb[0].mxu0 %vm268_vm2, %v429_v29 }
  0x25   : > { %1209 = vmatpush3.bf16.msra.mxu0 %v1351_v28  ;;  %1224 = vmatprep.mubr.msk.bf16.mxu0 %vm1424_vm1, %v1423_v1 }
  0x26   : > { %1210 = vmatprep.subr.bf16.mxu0 %v1423_v1 }
  0x28   : > { %1193 = vmatmul.mubr.msk.bf16.vlgmr.msra.gmra.mrb[0].mxu1 %vm268_vm2, %v1349_v5 }
  0x29   : > { %1211 = vmatpush3.bf16.msra.mxu0 %v1352_v30  ;;  %1249 = vmatpush3.bf16.msra.mxu1 %v1353_v31 }
  0x2a   : > { %1212 = vmatprep.subr.bf16.mxu0 %v1423_v1  ;;  %1250 = vmatprep.subr.bf16.mxu1 %v1423_v1 }
  0x2b   : > { %1264 = vmatprep.mubr.msk.bf16.mxu1 %vm1424_vm1, %v1423_v1 }
  0x2d   : > { %1213 = vmatpush3.bf16.msra.mxu0 %v1354_v32  ;;  %1251 = vmatpush3.bf16.msra.mxu1 %v1355_v33  ;;  %v935_v32 = vld [vmem:[%s226_s8] sm:$0xff] }
  0x2e   : > { %1214 = vmatprep.subr.bf16.mxu0 %v1423_v1  ;;  %1252 = vmatprep.subr.bf16.mxu1 %v1423_v1 }
  0x31   : > { %1215 = vmatpush3.bf16.msra.mxu0 %v1356_v34  ;;  %1253 = vmatpush3.bf16.msra.mxu1 %v1357_v35 }
  0x32   : > { %1216 = vmatprep.subr.bf16.mxu0 %v1423_v1  ;;  %1254 = vmatprep.subr.bf16.mxu1 %v1423_v1 }
  0x35   : > { %1217 = vmatpush3.bf16.msra.mxu0 %v1358_v36  ;;  %1255 = vmatpush3.bf16.msra.mxu1 %v1359_v37 }
  0x36   : > { %1218 = vmatprep.subr.bf16.mxu0 %v1423_v1  ;;  %1256 = vmatprep.subr.bf16.mxu1 %v1423_v1 }
  0x39   : > { %1219 = vmatpush3.bf16.msra.mxu0 %v1360_v38  ;;  %1257 = vmatpush3.bf16.msra.mxu1 %v1361_v39 }
  0x3a   : > { %1220 = vmatprep.subr.bf16.mxu0 %v1423_v1  ;;  %1258 = vmatprep.subr.bf16.mxu1 %v1423_v1 }
  0x3d   : > { %1221 = vmatpush3.bf16.msra.mxu0 %v1362_v40  ;;  %1259 = vmatpush3.bf16.msra.mxu1 %v1363_v41 }
  0x3e   : > { %1222 = vmatprep.subr.bf16.mxu0 %v1423_v1  ;;  %1260 = vmatprep.subr.bf16.mxu1 %v1423_v1 }
  0x41   : > { %1223 = vmatpush3.bf16.msra.mxu0 %v1364_v42  ;;  %1261 = vmatpush3.bf16.msra.mxu1 %v1365_v43 }
  0x42   : > { %1228 = vmatprep.subr.bf16.mxu0 %v1423_v1  ;;  %1262 = vmatprep.subr.bf16.mxu1 %v1423_v1 }
  0x45   : > { %1263 = vmatpush3.bf16.msra.mxu1 %v1367_v44 }
  0x46   : > { %1268 = vmatprep.subr.bf16.mxu1 %v1423_v1 }
  0xf7   : > { %v470_v51 = vpop.f32.mrb[0].mxu0 }
  0xf8   : > { %v1206_v52 = vpop.f32.mrb[1].mxu0 }
  0xf9   : > { %v473_v53 = vpop.f32.mrb[2].mxu0 }
  0xfa   : > { %v1207_v54 = vpop.f32.mrb[3].mxu0 }
  0xfb   : > { %v356_v55 = vpop.f32.mrb[0].mxu1 }
  0xfc   : > { %v1596_v56 = vadd.f32 %v470_v51, %v356_v55  ;;  %v1194_v58 = vpop.f32.mrb[1].mxu1 }
  0xfd   : > { %v359_v59 = vpop.f32.mrb[2].mxu1 }
  0xfe   : > { %v1606_v61 = vadd.f32 %v473_v53, %v359_v59  ;;  %v1195_v62 = vpop.f32.mrb[3].mxu1  ;;  %v496_v63 = vsel %vm1598_vm10, %v1596_v56, 0.0 }
 0x100   : > { %v497_v0 = vsel %vm1602_vm11, %v1606_v61, 0.0  ;;  %v1135_v2 = vpack.c.bf16 %v1606_v61, %v1596_v56 }
 0x101   : > { %v498_v3 = vpack.c.bf16 %v497_v0, %v496_v63 }
 0x103   : > { %v627_v5 = vshll.u32 %v498_v3, 16  ;;  %v533_v6 = vrot.slane %v498_v3, 1  ;;  %v624_v7 = vshrl.u32 %v498_v3, 16 }
 0x105   : > { %1225 = vmatmul.mubr.bf16.vlgmr.msra.gmra.mrb[4].mxu0 %v533_v6  ;;  %v737_v8 = vrot.slane %v627_v5, 1  ;;  %v626_v24 = vrot.slane %v624_v7, 1  ;;  %v629_v25 = vrot.slane %v627_v5, 2 }
 0x106   : > { %1229 = vmatpush3.bf16.msra.mxu0 %v1366_v4  ;;  %1244 = vmatprep.mubr.msk.bf16.mxu0 %vm1424_vm1, %v1423_v1 }
 0x107   : > { %1230 = vmatprep.subr.bf16.mxu0 %v1423_v1  ;;  %v738_v11 = vor.u32 %v737_v8, %v624_v7  ;;  %v630_v27 = vor.u32 %v629_v25, %v626_v24 }
 0x109   : > { %1265 = vmatmul.mubr.bf16.vlgmr.msra.gmra.mrb[4].mxu1 %v738_v11 }
 0x10a   : > { %1231 = vmatpush3.bf16.msra.mxu0 %v1368_v9  ;;  %1269 = vmatpush3.bf16.msra.mxu1 %v1369_v10 }
 0x10b   : > { %1232 = vmatprep.subr.bf16.mxu0 %v1423_v1  ;;  %1270 = vmatprep.subr.bf16.mxu1 %v1423_v1 }
 0x10c   : > { %1284 = vmatprep.mubr.msk.bf16.mxu1 %vm1424_vm1, %v1423_v1 }
 0x10e   : > { %1233 = vmatpush3.bf16.msra.mxu0 %v1370_v12  ;;  %1271 = vmatpush3.bf16.msra.mxu1 %v1371_v13 }
 0x10f   : > { %1234 = vmatprep.subr.bf16.mxu0 %v1423_v1  ;;  %1272 = vmatprep.subr.bf16.mxu1 %v1423_v1 }
 0x112   : > { %1235 = vmatpush3.bf16.msra.mxu0 %v1372_v14  ;;  %1273 = vmatpush3.bf16.msra.mxu1 %v1373_v15 }
 0x113   : > { %1236 = vmatprep.subr.bf16.mxu0 %v1423_v1  ;;  %1274 = vmatprep.subr.bf16.mxu1 %v1423_v1 }
 0x116   : > { %1237 = vmatpush3.bf16.msra.mxu0 %v1374_v16  ;;  %1275 = vmatpush3.bf16.msra.mxu1 %v1375_v17 }
 0x117   : > { %1238 = vmatprep.subr.bf16.mxu0 %v1423_v1  ;;  %1276 = vmatprep.subr.bf16.mxu1 %v1423_v1 }
 0x11a   : > { %1239 = vmatpush3.bf16.msra.mxu0 %v1376_v18  ;;  %1277 = vmatpush3.bf16.msra.mxu1 %v1377_v19 }
 0x11b   : > { %1240 = vmatprep.subr.bf16.mxu0 %v1423_v1  ;;  %1278 = vmatprep.subr.bf16.mxu1 %v1423_v1 }
 0x11e   : > { %1241 = vmatpush3.bf16.msra.mxu0 %v1378_v20  ;;  %1279 = vmatpush3.bf16.msra.mxu1 %v1379_v21 }
 0x11f   : > { %1242 = vmatprep.subr.bf16.mxu0 %v1423_v1  ;;  %1280 = vmatprep.subr.bf16.mxu1 %v1423_v1 }
 0x122   : > { %1243 = vmatpush3.bf16.msra.mxu0 %v1380_v22  ;;  %1281 = vmatpush3.bf16.msra.mxu1 %v1381_v23 }
 0x123   : > { %1282 = vmatprep.subr.bf16.mxu1 %v1423_v1 }
 0x125   : > { %1245 = vmatmul.mubr.bf16.vlgmr.msra.gmra.mrb[4].mxu0 %v630_v27 }
 0x126   : > { %1283 = vmatpush3.bf16.msra.mxu1 %v1382_v26 }
 0x129   : > { %1285 = vmatmul.mubr.msk.bf16.vlgmr.msra.gmra.mrb[4].mxu1 %vm1134_vm12, %v1135_v2 }
 0x1f8   : > { %v714_v28 = vpop.f32.mrb[4].mxu0 }
 0x1f9   : > { %v1246_v29 = vpop.f32.mrb[5].mxu0 }
 0x1fa   : > { %v717_v1 = vpop.f32.mrb[6].mxu0 }
 0x1fb   : > { %v1247_v30 = vpop.f32.mrb[7].mxu0 }
 0x1fc   : > { %v928_v31 = vpop.f32.mrb[4].mxu1 }
 0x1fd   : > { %v1290_v33 = vadd.f32 %v928_v31, %v714_v28  ;;  %v1286_v34 = vpop.f32.mrb[5].mxu1 }
 0x1fe   : > { %v931_v35 = vpop.f32.mrb[6].mxu1 }
 0x1ff   : > { %v936_v36 = vmul.f32 %v1290_v33, %v935_v32  ;;  %v1287_v37 = vpop.f32.mrb[7].mxu1 }
 0x201   : > { %937 = vst.msk [vmem:[%s234_s11] sm:$0xff] %vm268_vm2, %v936_v36 }
 0x202 PF: > { %s14_s19 = sadd.s32 1, %s1421_s19   ;;  %s1720_s15 = smov %s1413_s17 }
 0x203   : > { %p11_p7 = scmp.ge.s32.totalorder %s14_s19, 6   ;;  %s1721_s16 = smov %s1417_s18 }
 0x204   : > { %s1722_s17 = smov %s1725_s20  ;;  %s1723_s18 = smov %s1729_s21 }
 0x205   :  { %13 = sbr.rel (!%p11_p7) target bundleno = 3 (0x3), region = 76 }

</bundles_post_ra>
